<compile_context>
chip_gen: v6e
topology: v6e:2x2x1
jax: 0.10.0
libtpu: 0.0.40
codegen_flags: <defaults>
</compile_context>

<pallas_src>
import functools

import jax
import jax.numpy as jnp
from jax.experimental import pallas as pl
from jax.experimental.pallas import tpu as pltpu

LANE = 128      # lane width of a vreg (last dim granularity)
SUBLANE = 8     # f32 sublane granularity (second-to-last dim)


def _round_up(x, m):
    return (x + m - 1) // m * m


def _fcnn_fused_kernel(x_ref, w_ref, b_ref, o_ref, *, num_linear: int):
    """Whole FCNN forward on one batch tile.

    x_ref: (tb, Dp)        padded activations (zero in padded columns)
    w_ref: (L, Dp, Dp)     padded weights, w[l, i, j]: in-dim i -> out-dim j
    b_ref: (L, 1, Dp)      padded biases (f32)
    o_ref: (tb, Dp)        padded output
    """
    x = x_ref[...].astype(jnp.float32)
    for l in range(num_linear):            # static unroll: traced once
        y = jnp.dot(x, w_ref[l], preferred_element_type=jnp.float32)
        y = y + b_ref[l]                   # (1, Dp) broadcast over rows
        if l != num_linear - 1:
            y = jnp.maximum(y, 0.0)        # ReLU on all but the last layer
        x = y
    o_ref[...] = x.astype(o_ref.dtype)


def prepare_fcnn_params(params, input_dim, dtype=jnp.float32):
    """Pad & stack layer params once (hoisted out of the per-call path).

    params: list of (w, b) with w: (d_in, d_out), b: (1, d_out)
    Returns (ws, bs, Dp, Dout):
      ws: (L, Dp, Dp) zero-padded weights
      bs: (L, 1, Dp)  zero-padded f32 biases
    Zero padding keeps padded activation columns exactly zero through every
    layer (padded weight rows/cols are 0, padded bias entries are 0, ReLU(0)=0).
    """
    L = len(params)
    d_ins = [w.shape[0] for w, _ in params]
    d_outs = [w.shape[1] for w, _ in params]
    Dout = d_outs[-1]
    Dp = _round_up(max([input_dim] + d_ins + d_outs), LANE)

    ws = jnp.zeros((L, Dp, Dp), dtype)
    bs = jnp.zeros((L, 1, Dp), jnp.float32)
    for l, (w, b) in enumerate(params):
        ws = ws.at[l, : w.shape[0], : w.shape[1]].set(w.astype(dtype))
        bs = bs.at[l, :1, : b.shape[1]].set(b.astype(jnp.float32))
    return ws, bs, Dp, Dout


@functools.partial(jax.jit, static_argnames=("Dout", "block_b"))
def fcnn_apply(ws, bs, x, *, Dout: int, block_b: int = 128):
    """Run the fused FCNN kernel on pre-padded params.

    ws: (L, Dp, Dp), bs: (L, 1, Dp), x: (B, Din)
    """
    L, Dp, _ = ws.shape
    B, Din = x.shape

    # Batch tile: sublane-aligned, capped so big batches get a real grid.
    tb = min(block_b, _round_up(B, SUBLANE))
    Bp = _round_up(B, tb)

    # Pad activations to lane-dense (Bp, Dp); padded columns are zero.
    xp = jnp.zeros((Bp, Dp), x.dtype).at[:B, :Din].set(x)

    kernel = functools.partial(_fcnn_fused_kernel, num_linear=L)
    flops = 2 * Bp * Dp * Dp * L
    out_p = pl.pallas_call(
        kernel,
        out_shape=jax.ShapeDtypeStruct((Bp, Dp), x.dtype),
        grid=(Bp // tb,),
        in_specs=[
            pl.BlockSpec((tb, Dp), lambda i: (i, 0)),          # activations: tiled on batch
            pl.BlockSpec((L, Dp, Dp), lambda i: (0, 0, 0)),    # weights: resident (same block)
            pl.BlockSpec((L, 1, Dp), lambda i: (0, 0, 0)),     # biases:  resident (same block)
        ],
        out_specs=pl.BlockSpec((tb, Dp), lambda i: (i, 0)),
        compiler_params=pltpu.CompilerParams(
            dimension_semantics=("parallel",),        # shard batch tiles across TCs (v7x)
            vmem_limit_bytes=64 * 1024 * 1024,        # fits v5e/v6e/v7x budgets
        ),
        cost_estimate=pl.CostEstimate(
            flops=flops,
            transcendentals=0,
            bytes_accessed=(xp.size + ws.size + bs.size + Bp * Dp) * 4,
        ),
    )(xp, ws, bs)

    return out_p[:B, :Dout]


def fcnn_forward(params, x, *, block_b: int = 128):
    """Convenience wrapper: pad params then run the fused kernel."""
    ws, bs, _, Dout = prepare_fcnn_params(params, x.shape[1], x.dtype)
    return fcnn_apply(ws, bs, x, Dout=Dout, block_b=block_b)


def init_fcnn_params(key, input_dim, output_dim, hid_size, num_layers):
    """Deterministic parameter init mirroring FCNN.__init__ shapes.

    Linear layers: [(input_dim -> hid), (hid -> hid) x (num_layers-1), (hid -> output_dim)]
    Weights stored as (d_in, d_out) (transposed vs. nn.Linear.weight); biases as (1, d_out).
    """
    dims = [input_dim] + [hid_size] * num_layers + [output_dim]
    params = []
    for i in range(len(dims) - 1):
        d_in, d_out = dims[i], dims[i + 1]
        key, wk, bk = jax.random.split(key, 3)
        bound = 1.0 / jnp.sqrt(jnp.float32(d_in))  # PyTorch default uniform bound
        w = jax.random.uniform(wk, (d_in, d_out), jnp.float32, -bound, bound)
        b = jax.random.uniform(bk, (1, d_out), jnp.float32, -bound, bound)
        params.append((w, b))
    return params


def fcnn_forward_ref(params, x):
    n = len(params)
    for idx, (w, b) in enumerate(params):
        x = x @ w + b
        if idx != n - 1:
            x = jnp.maximum(x, 0.0)
    return x


if __name__ == "__main__":
    # Small shapes consistent with the module: batch=8, input_dim=16,
    # hid_size=32, output_dim=8, num_layers=3  -> 4 Linear layers.
    batch, input_dim, output_dim, hid_size, num_layers = 8, 16, 8, 32, 3

    key = jax.random.PRNGKey(0)
    key, xk = jax.random.split(key)
    x = jax.random.normal(xk, (batch, input_dim), dtype=jnp.float32)

    params = init_fcnn_params(key, input_dim, output_dim, hid_size, num_layers)

    out = fcnn_forward(params, x)
    out = jax.block_until_ready(out)

    # sanity check against a pure-JAX reference
    ref = fcnn_forward_ref(params, x)
    assert out.shape == (batch, output_dim)
    assert jnp.allclose(out, ref, atol=1e-4, rtol=1e-4), (
        float(jnp.max(jnp.abs(out - ref)))
    )

    print("KERNEL_OK")
</pallas_src>

<mosaic_0001>
module attributes {stable_mosaic.version = 11 : i64} {
  func.func @_fcnn_fused_kernel(%arg0: i32, %arg1: memref<8x128xf32, #tpu.memory_space<vmem>>, %arg2: memref<4x128x128xf32, #tpu.memory_space<vmem>>, %arg3: memref<4x1x128xf32, #tpu.memory_space<vmem>>, %arg4: memref<8x128xf32, #tpu.memory_space<vmem>>) attributes {dimension_semantics = [#tpu.dimension_semantics<parallel>], iteration_bounds = array<i64: 1>, scalar_prefetch = 0 : i64, scratch_operands = 0 : i64, tpu.core_type = #tpu.core_type<tc>, window_params = [{transform_indices = @transform_0, window_bounds = array<i64: 8, 128>}, {pipeline_mode = #tpu.pipeline_mode<synchronous>, transform_indices = @transform_1, window_bounds = array<i64: 4, 128, 128>}, {pipeline_mode = #tpu.pipeline_mode<synchronous>, transform_indices = @transform_2, window_bounds = array<i64: 4, 1, 128>}, {transform_indices = @transform_3, window_bounds = array<i64: 8, 128>}]} {
    %c0 = arith.constant 0 : index
    %c0_0 = arith.constant 0 : index
    %0 = vector.load %arg1[%c0, %c0_0] : memref<8x128xf32, #tpu.memory_space<vmem>>, vector<8x128xf32>
    %c0_1 = arith.constant 0 : index
    %c0_2 = arith.constant 0 : index
    %c0_3 = arith.constant 0 : index
    %1 = vector.load %arg2[%c0_1, %c0_2, %c0_3] : memref<4x128x128xf32, #tpu.memory_space<vmem>>, vector<1x128x128xf32>
    %2 = vector.shape_cast %1 : vector<1x128x128xf32> to vector<128x128xf32>
    %cst = arith.constant dense<0.000000e+00> : vector<8x128xf32>
    %3 = tpu.matmul %0, %2, %cst {dimension_numbers = #tpu.dot_dimension_numbers<[1], [0], [0], [1], [0, 0, 1, 1], [], []>} : vector<8x128xf32>, vector<128x128xf32>, vector<8x128xf32> -> vector<8x128xf32>
    %c0_4 = arith.constant 0 : index
    %c0_5 = arith.constant 0 : index
    %c0_6 = arith.constant 0 : index
    %4 = vector.load %arg3[%c0_4, %c0_5, %c0_6] : memref<4x1x128xf32, #tpu.memory_space<vmem>>, vector<1x1x128xf32>
    %5 = vector.shape_cast %4 : vector<1x1x128xf32> to vector<1x128xf32>
    %6 = vector.broadcast %5 : vector<1x128xf32> to vector<8x128xf32>
    %7 = arith.addf %3, %6 : vector<8x128xf32>
    %cst_7 = arith.constant 0.000000e+00 : f32
    %8 = vector.broadcast %cst_7 : f32 to vector<8x128xf32>
    %9 = arith.maximumf %7, %8 : vector<8x128xf32>
    %c1 = arith.constant 1 : index
    %c0_8 = arith.constant 0 : index
    %c0_9 = arith.constant 0 : index
    %10 = vector.load %arg2[%c1, %c0_8, %c0_9] : memref<4x128x128xf32, #tpu.memory_space<vmem>>, vector<1x128x128xf32>
    %11 = vector.shape_cast %10 : vector<1x128x128xf32> to vector<128x128xf32>
    %cst_10 = arith.constant dense<0.000000e+00> : vector<8x128xf32>
    %12 = tpu.matmul %9, %11, %cst_10 {dimension_numbers = #tpu.dot_dimension_numbers<[1], [0], [0], [1], [0, 0, 1, 1], [], []>} : vector<8x128xf32>, vector<128x128xf32>, vector<8x128xf32> -> vector<8x128xf32>
    %c1_11 = arith.constant 1 : index
    %c0_12 = arith.constant 0 : index
    %c0_13 = arith.constant 0 : index
    %13 = vector.load %arg3[%c1_11, %c0_12, %c0_13] : memref<4x1x128xf32, #tpu.memory_space<vmem>>, vector<1x1x128xf32>
    %14 = vector.shape_cast %13 : vector<1x1x128xf32> to vector<1x128xf32>
    %15 = vector.broadcast %14 : vector<1x128xf32> to vector<8x128xf32>
    %16 = arith.addf %12, %15 : vector<8x128xf32>
    %cst_14 = arith.constant 0.000000e+00 : f32
    %17 = vector.broadcast %cst_14 : f32 to vector<8x128xf32>
    %18 = arith.maximumf %16, %17 : vector<8x128xf32>
    %c2 = arith.constant 2 : index
    %c0_15 = arith.constant 0 : index
    %c0_16 = arith.constant 0 : index
    %19 = vector.load %arg2[%c2, %c0_15, %c0_16] : memref<4x128x128xf32, #tpu.memory_space<vmem>>, vector<1x128x128xf32>
    %20 = vector.shape_cast %19 : vector<1x128x128xf32> to vector<128x128xf32>
    %cst_17 = arith.constant dense<0.000000e+00> : vector<8x128xf32>
    %21 = tpu.matmul %18, %20, %cst_17 {dimension_numbers = #tpu.dot_dimension_numbers<[1], [0], [0], [1], [0, 0, 1, 1], [], []>} : vector<8x128xf32>, vector<128x128xf32>, vector<8x128xf32> -> vector<8x128xf32>
    %c2_18 = arith.constant 2 : index
    %c0_19 = arith.constant 0 : index
    %c0_20 = arith.constant 0 : index
    %22 = vector.load %arg3[%c2_18, %c0_19, %c0_20] : memref<4x1x128xf32, #tpu.memory_space<vmem>>, vector<1x1x128xf32>
    %23 = vector.shape_cast %22 : vector<1x1x128xf32> to vector<1x128xf32>
    %24 = vector.broadcast %23 : vector<1x128xf32> to vector<8x128xf32>
    %25 = arith.addf %21, %24 : vector<8x128xf32>
    %cst_21 = arith.constant 0.000000e+00 : f32
    %26 = vector.broadcast %cst_21 : f32 to vector<8x128xf32>
    %27 = arith.maximumf %25, %26 : vector<8x128xf32>
    %c3 = arith.constant 3 : index
    %c0_22 = arith.constant 0 : index
    %c0_23 = arith.constant 0 : index
    %28 = vector.load %arg2[%c3, %c0_22, %c0_23] : memref<4x128x128xf32, #tpu.memory_space<vmem>>, vector<1x128x128xf32>
    %29 = vector.shape_cast %28 : vector<1x128x128xf32> to vector<128x128xf32>
    %cst_24 = arith.constant dense<0.000000e+00> : vector<8x128xf32>
    %30 = tpu.matmul %27, %29, %cst_24 {dimension_numbers = #tpu.dot_dimension_numbers<[1], [0], [0], [1], [0, 0, 1, 1], [], []>} : vector<8x128xf32>, vector<128x128xf32>, vector<8x128xf32> -> vector<8x128xf32>
    %c3_25 = arith.constant 3 : index
    %c0_26 = arith.constant 0 : index
    %c0_27 = arith.constant 0 : index
    %31 = vector.load %arg3[%c3_25, %c0_26, %c0_27] : memref<4x1x128xf32, #tpu.memory_space<vmem>>, vector<1x1x128xf32>
    %32 = vector.shape_cast %31 : vector<1x1x128xf32> to vector<1x128xf32>
    %33 = vector.broadcast %32 : vector<1x128xf32> to vector<8x128xf32>
    %34 = arith.addf %30, %33 : vector<8x128xf32>
    %c0_28 = arith.constant 0 : index
    %c0_29 = arith.constant 0 : index
    %35 = vector.load %arg4[%c0_28, %c0_29] : memref<8x128xf32, #tpu.memory_space<vmem>>, vector<8x128xf32>
    tpu.vector_store %arg4[%c0_28, %c0_29], %34 {strides = array<i32>} : memref<8x128xf32, #tpu.memory_space<vmem>>, vector<8x128xf32>,
    return
  }
  func.func @transform_0(%arg0: i32) -> (i32, i32) {
    %c0_i32 = arith.constant 0 : i32
    %c0_i32_0 = arith.constant 0 : i32
    return %arg0, %c0_i32 : i32, i32
  }
  func.func @transform_1(%arg0: i32) -> (i32, i32, i32) {
    %c0_i32 = arith.constant 0 : i32
    %c0_i32_0 = arith.constant 0 : i32
    %c0_i32_1 = arith.constant 0 : i32
    %c0_i32_2 = arith.constant 0 : i32
    return %c0_i32, %c0_i32_0, %c0_i32_1 : i32, i32, i32
  }
  func.func @transform_2(%arg0: i32) -> (i32, i32, i32) {
    %c0_i32 = arith.constant 0 : i32
    %c0_i32_0 = arith.constant 0 : i32
    %c0_i32_1 = arith.constant 0 : i32
    %c0_i32_2 = arith.constant 0 : i32
    return %c0_i32, %c0_i32_0, %c0_i32_1 : i32, i32, i32
  }
  func.func @transform_3(%arg0: i32) -> (i32, i32) {
    %c0_i32 = arith.constant 0 : i32
    %c0_i32_0 = arith.constant 0 : i32
    return %arg0, %c0_i32 : i32, i32
  }
}

</mosaic_0001>

<bundles_post_ra>
// kernel: fcnn_apply.1
= control target key start
LH: loop header
LB: loop body
LE: loop exit
PB: predicated region body
PF: predicated region fallthrough
CT: control target
= control target key end

     0   :  { %8 = vsyncpa [#allocation3], 0  ;;  %s811_s0 = inlined_call_operand.vmem [shape: f32[8,128], index: 0, kind: input, shape index: {}]   ;;  %s812_s1 = inlined_call_operand.hbm [shape: f32[4,128,128], index: 1, kind: input, shape index: {}]   ;;  %s813_s2 = inlined_call_operand.vmem [shape: f32[4,1,128], index: 2, kind: input, shape index: {}]   ;;  %s814_s3 = inlined_call_operand.hbm [shape: f32[8,128], index: 3, kind: output, shape index: {}]  }
   0x1   :  { %9 = vsyncpa [#allocation4], 0  ;;  %s692_s12 = smov [#allocation2]  }
   0x2   :  { %s17_s13 = sshll.u32 %s692_s12, 4  ;;  %s18_s13 = int_to_ptr.vmem [resolvable:$true] %s17_s13 }
   0x3   :  { %s656_s14 = scalar_lea.vmem %s18_s13, 8192  ;;  %p661_p1 = scmp.lt.s32.totalorder %s18_s13, %s18_s13 }
   0x4   :  { %p657_p0 = scmp.ne.s32.totalorder %s18_s13, %s656_s14  ;;  %p662_p2 = scmp.lt.s32.totalorder %s656_s14, %s656_s14 }
   0x6   :  { %p663_p3 = por %p662_p2, %p661_p1 }
   0x8   :  { %p664_p4 = pnand %p663_p3, %p657_p0 }
   0xa   :  { %667 = shalt.err (!%p664_p4)
}
   0xb   :  { %s693_s15 = smov 128   ;;  %s694_s16 = smov 8  }
   0xc   :  { %23 = dma.hbm_to_vmem [thread:$0]  %s812_s1, 8192, %s18_s13, [#allocation3], %s693_s15, %s693_s15, %s694_s16  }
   0xd   :  { %688 = dma.done.wait [#allocation3], 8192  }
   0xe   :  { %689 = vsyncadd [#allocation3], 4294959104  ;;  %v695_v0 = vmov 0.0   ;;  %vm696_vm0 = vmmov 0   ;;  %v45_v1 = vld [vmem:[#allocation2 + $0x78] sm:$0xff]  ;;  %v44_v2 = vld [vmem:[#allocation2 + $0x70] sm:$0xff] }
   0xf   :  { %502 = vmatprep.subr.mxu0 %v695_v0  ;;  %534 = vmatprep.mubr.msk.f32.mxu0 %vm696_vm0, %v695_v0  ;;  %v43_v3 = vld [vmem:[#allocation2 + $0x68] sm:$0xff]  ;;  %v42_v4 = vld [vmem:[#allocation2 + $0x60] sm:$0xff]  ;;  %v140_v5 = vld [vmem:[#allocation2 + $0xf8] sm:$0xff]  ;;  %s697_s27 = smov [#allocation5]  }
  0x10   :  { %537 = vmatprep.subr.mxu1 %v695_v0  ;;  %569 = vmatprep.mubr.msk.f32.mxu1 %vm696_vm0, %v695_v0  ;;  %v41_v6 = vld [vmem:[#allocation2 + $0x58] sm:$0xff]  ;;  %v139_v7 = vld [vmem:[#allocation2 + $0xf0] sm:$0xff]  ;;  %v138_v8 = vld [vmem:[#allocation2 + $0xe8] sm:$0xff]  ;;  %s418_s28 = sshll.u32 %s697_s27, 4  ;;  %s419_s28 = int_to_ptr.vmem [resolvable:$true] %s418_s28 }
  0x11   :  { %503 = vmatpush3.msra.mxu0 %v45_v1  ;;  %538 = vmatpush3.msra.mxu1 %v140_v5  ;;  %v40_v9 = vld [vmem:[#allocation2 + $0x50] sm:$0xff]  ;;  %v137_v10 = vld [vmem:[#allocation2 + $0xe0] sm:$0xff]  ;;  %v39_v11 = vld [vmem:[#allocation2 + $0x48] sm:$0xff]  ;;  %s668_s29 = scalar_lea.vmem %s419_s28, 128  ;;  %p673_p6 = scmp.lt.s32.totalorder %s419_s28, %s419_s28 }
  0x12   :  { %504 = vmatprep.subr.mxu0 %v695_v0  ;;  %539 = vmatprep.subr.mxu1 %v695_v0  ;;  %v136_v12 = vld [vmem:[#allocation2 + $0xd8] sm:$0xff]  ;;  %v38_v13 = vld [vmem:[#allocation2 + $0x40] sm:$0xff]  ;;  %v135_v14 = vld [vmem:[#allocation2 + $0xd0] sm:$0xff]  ;;  %p669_p5 = scmp.ne.s32.totalorder %s419_s28, %s668_s29  ;;  %p674_p7 = scmp.lt.s32.totalorder %s668_s29, %s668_s29 }
  0x13   :  { %505 = vmatpush3.msra.mxu0 %v44_v2  ;;  %540 = vmatpush3.msra.mxu1 %v139_v7  ;;  %v37_v15 = vld [vmem:[#allocation2 + $0x38] sm:$0xff]  ;;  %v134_v16 = vld [vmem:[#allocation2 + $0xc8] sm:$0xff]  ;;  %v36_v17 = vld [vmem:[#allocation2 + $0x30] sm:$0xff] }
  0x14   :  { %506 = vmatprep.subr.mxu0 %v695_v0  ;;  %541 = vmatprep.subr.mxu1 %v695_v0  ;;  %v133_v18 = vld [vmem:[#allocation2 + $0xc0] sm:$0xff]  ;;  %v35_v19 = vld [vmem:[#allocation2 + $0x28] sm:$0xff]  ;;  %v132_v20 = vld [vmem:[#allocation2 + $0xb8] sm:$0xff]  ;;  %p675_p8 = por %p674_p7, %p673_p6 }
  0x15   :  { %507 = vmatpush3.msra.mxu0 %v43_v3  ;;  %542 = vmatpush3.msra.mxu1 %v138_v8  ;;  %v34_v21 = vld [vmem:[#allocation2 + $0x20] sm:$0xff]  ;;  %v131_v22 = vld [vmem:[#allocation2 + $0xb0] sm:$0xff]  ;;  %v33_v23 = vld [vmem:[#allocation2 + $0x18] sm:$0xff] }
  0x16   :  { %508 = vmatprep.subr.mxu0 %v695_v0  ;;  %543 = vmatprep.subr.mxu1 %v695_v0  ;;  %v130_v24 = vld [vmem:[#allocation2 + $0xa8] sm:$0xff]  ;;  %v32_v25 = vld [vmem:[#allocation2 + $0x10] sm:$0xff]  ;;  %v129_v26 = vld [vmem:[#allocation2 + $0xa0] sm:$0xff]  ;;  %p676_p9 = pnand %p675_p8, %p669_p5 }
  0x17   :  { %509 = vmatpush3.msra.mxu0 %v42_v4  ;;  %544 = vmatpush3.msra.mxu1 %v137_v10  ;;  %v31_v27 = vld [vmem:[#allocation2 + $0x8] sm:$0xff]  ;;  %v128_v28 = vld [vmem:[#allocation2 + $0x98] sm:$0xff]  ;;  %v30_v29 = vld [vmem:[#allocation2] sm:$0xff] }
  0x18   :  { %510 = vmatprep.subr.mxu0 %v695_v0  ;;  %545 = vmatprep.subr.mxu1 %v695_v0  ;;  %v29_v30 = vld [vmem:[%s811_s0] sm:$0xff]  ;;  %v127_v31 = vld [vmem:[#allocation2 + $0x90] sm:$0xff]  ;;  %v126_v32 = vld [vmem:[#allocation2 + $0x88] sm:$0xff] }
  0x19   :  { %511 = vmatpush3.msra.mxu0 %v41_v6  ;;  %546 = vmatpush3.msra.mxu1 %v136_v12  ;;  %v125_v33 = vld [vmem:[#allocation2 + $0x80] sm:$0xff]  ;;  %v236_v34 = vld [vmem:[#allocation2 + $0x178] sm:$0xff]  ;;  %v235_v35 = vld [vmem:[#allocation2 + $0x170] sm:$0xff] }
  0x1a   :  { %512 = vmatprep.subr.mxu0 %v695_v0  ;;  %547 = vmatprep.subr.mxu1 %v695_v0  ;;  %v234_v36 = vld [vmem:[#allocation2 + $0x168] sm:$0xff]  ;;  %v233_v37 = vld [vmem:[#allocation2 + $0x160] sm:$0xff]  ;;  %v232_v38 = vld [vmem:[#allocation2 + $0x158] sm:$0xff] }
  0x1b   :  { %513 = vmatpush3.msra.mxu0 %v40_v9  ;;  %548 = vmatpush3.msra.mxu1 %v135_v14  ;;  %v231_v39 = vld [vmem:[#allocation2 + $0x150] sm:$0xff]  ;;  %v230_v40 = vld [vmem:[#allocation2 + $0x148] sm:$0xff]  ;;  %v229_v41 = vld [vmem:[#allocation2 + $0x140] sm:$0xff] }
  0x1c   :  { %514 = vmatprep.subr.mxu0 %v695_v0  ;;  %549 = vmatprep.subr.mxu1 %v695_v0  ;;  %v228_v42 = vld [vmem:[#allocation2 + $0x138] sm:$0xff]  ;;  %v227_v43 = vld [vmem:[#allocation2 + $0x130] sm:$0xff]  ;;  %v226_v44 = vld [vmem:[#allocation2 + $0x128] sm:$0xff] }
  0x1d   :  { %515 = vmatpush3.msra.mxu0 %v39_v11  ;;  %550 = vmatpush3.msra.mxu1 %v134_v16  ;;  %v225_v45 = vld [vmem:[#allocation2 + $0x120] sm:$0xff]  ;;  %v224_v46 = vld [vmem:[#allocation2 + $0x118] sm:$0xff]  ;;  %v223_v52 = vld [vmem:[#allocation2 + $0x110] sm:$0xff] }
  0x1e   :  { %516 = vmatprep.subr.mxu0 %v695_v0  ;;  %551 = vmatprep.subr.mxu1 %v695_v0  ;;  %v427_v47 = vld [vmem:[%s813_s2] ss:$0 sm:$0xff]  ;;  %v222_v53 = vld [vmem:[#allocation2 + $0x108] sm:$0xff]  ;;  %v332_v55 = vld [vmem:[#allocation2 + $0x1f8] sm:$0xff] }
  0x1f   :  { %517 = vmatpush3.msra.mxu0 %v38_v13  ;;  %552 = vmatpush3.msra.mxu1 %v133_v18  ;;  %v221_v54 = vld [vmem:[#allocation2 + $0x100] sm:$0xff]  ;;  %v331_v56 = vld [vmem:[#allocation2 + $0x1f0] sm:$0xff]  ;;  %v330_v57 = vld [vmem:[#allocation2 + $0x1e8] sm:$0xff] }
  0x20   :  { %518 = vmatprep.subr.mxu0 %v695_v0  ;;  %553 = vmatprep.subr.mxu1 %v695_v0  ;;  %v329_v58 = vld [vmem:[#allocation2 + $0x1e0] sm:$0xff]  ;;  %v328_v59 = vld [vmem:[#allocation2 + $0x1d8] sm:$0xff]  ;;  %v327_v60 = vld [vmem:[#allocation2 + $0x1d0] sm:$0xff] }
  0x21   :  { %519 = vmatpush3.msra.mxu0 %v37_v15  ;;  %554 = vmatpush3.msra.mxu1 %v132_v20  ;;  %v326_v61 = vld [vmem:[#allocation2 + $0x1c8] sm:$0xff]  ;;  %v325_v62 = vld [vmem:[#allocation2 + $0x1c0] sm:$0xff]  ;;  %v324_v63 = vld [vmem:[#allocation2 + $0x1b8] sm:$0xff] }
  0x22   :  { %520 = vmatprep.subr.mxu0 %v695_v0  ;;  %555 = vmatprep.subr.mxu1 %v695_v0  ;;  %v323_v1 = vld [vmem:[#allocation2 + $0x1b0] sm:$0xff]  ;;  %v322_v2 = vld [vmem:[#allocation2 + $0x1a8] sm:$0xff]  ;;  %v321_v3 = vld [vmem:[#allocation2 + $0x1a0] sm:$0xff] }
  0x23   :  { %521 = vmatpush3.msra.mxu0 %v36_v17  ;;  %556 = vmatpush3.msra.mxu1 %v131_v22  ;;  %v320_v4 = vld [vmem:[#allocation2 + $0x198] sm:$0xff]  ;;  %v429_v5 = vld [vmem:[%s813_s2 + $0x1] ss:$0 sm:$0xff]  ;;  %v319_v10 = vld [vmem:[#allocation2 + $0x190] sm:$0xff] }
  0x24   :  { %522 = vmatprep.subr.mxu0 %v695_v0  ;;  %557 = vmatprep.subr.mxu1 %v695_v0  ;;  %v318_v11 = vld [vmem:[#allocation2 + $0x188] sm:$0xff]  ;;  %v317_v12 = vld [vmem:[#allocation2 + $0x180] sm:$0xff] }
  0x25   :  { %523 = vmatpush3.msra.mxu0 %v35_v19  ;;  %558 = vmatpush3.msra.mxu1 %v130_v24  ;;  %v431_v13 = vld [vmem:[%s813_s2 + $0x2] ss:$0 sm:$0xff]  ;;  %v433_v18 = vld [vmem:[%s813_s2 + $0x3] ss:$0 sm:$0xff] }
  0x26   :  { %524 = vmatprep.subr.mxu0 %v695_v0  ;;  %559 = vmatprep.subr.mxu1 %v695_v0 }
  0x27   :  { %525 = vmatpush3.msra.mxu0 %v34_v21  ;;  %560 = vmatpush3.msra.mxu1 %v129_v26 }
  0x28   :  { %526 = vmatprep.subr.mxu0 %v695_v0  ;;  %561 = vmatprep.subr.mxu1 %v695_v0 }
  0x29   :  { %527 = vmatpush3.msra.mxu0 %v33_v23  ;;  %562 = vmatpush3.msra.mxu1 %v128_v28 }
  0x2a   :  { %528 = vmatprep.subr.mxu0 %v695_v0  ;;  %563 = vmatprep.subr.mxu1 %v695_v0 }
  0x2b   :  { %529 = vmatpush3.msra.mxu0 %v32_v25  ;;  %564 = vmatpush3.msra.mxu1 %v127_v31 }
  0x2c   :  { %530 = vmatprep.subr.mxu0 %v695_v0  ;;  %565 = vmatprep.subr.mxu1 %v695_v0 }
  0x2d   :  { %531 = vmatpush3.msra.mxu0 %v31_v27  ;;  %566 = vmatpush3.msra.mxu1 %v126_v32 }
  0x2e   :  { %532 = vmatprep.subr.mxu0 %v695_v0  ;;  %567 = vmatprep.subr.mxu1 %v695_v0 }
  0x2f   :  { %533 = vmatpush3.msra.mxu0 %v30_v29  ;;  %568 = vmatpush3.msra.mxu1 %v125_v33 }
  0x30   :  { %535 = vmatmul.mubr.f32.vlgmr.msra.gmra.mxu0 %v29_v30  ;;  %572 = vmatprep.subr.mxu0 %v695_v0 }
  0x31   :  { %604 = vmatprep.mubr.msk.f32.mxu0 %vm696_vm0, %v695_v0  ;;  %607 = vmatprep.subr.mxu1 %v695_v0 }
  0x32   :  { %573 = vmatpush3.msra.mxu0 %v236_v34 }
  0x33   :  { %574 = vmatprep.subr.mxu0 %v695_v0 }
  0x34   :  { %575 = vmatpush3.msra.mxu0 %v235_v35 }
  0x35   :  { %576 = vmatprep.subr.mxu0 %v695_v0 }
  0x36   :  { %577 = vmatpush3.msra.mxu0 %v234_v36 }
  0x37   :  { %578 = vmatprep.subr.mxu0 %v695_v0 }
  0x38   :  { %579 = vmatpush3.msra.mxu0 %v233_v37 }
  0x39   :  { %580 = vmatprep.subr.mxu0 %v695_v0 }
  0x3a   :  { %581 = vmatpush3.msra.mxu0 %v232_v38 }
  0x3b   :  { %582 = vmatprep.subr.mxu0 %v695_v0 }
  0x3c   :  { %583 = vmatpush3.msra.mxu0 %v231_v39 }
  0x3d   :  { %584 = vmatprep.subr.mxu0 %v695_v0 }
  0x3e   :  { %585 = vmatpush3.msra.mxu0 %v230_v40 }
  0x3f   :  { %586 = vmatprep.subr.mxu0 %v695_v0 }
  0x40   :  { %587 = vmatpush3.msra.mxu0 %v229_v41 }
  0x41   :  { %588 = vmatprep.subr.mxu0 %v695_v0 }
  0x42   :  { %589 = vmatpush3.msra.mxu0 %v228_v42 }
  0x43   :  { %590 = vmatprep.subr.mxu0 %v695_v0 }
  0x44   :  { %591 = vmatpush3.msra.mxu0 %v227_v43 }
  0x45   :  { %592 = vmatprep.subr.mxu0 %v695_v0 }
  0x46   :  { %593 = vmatpush3.msra.mxu0 %v226_v44 }
  0x47   :  { %594 = vmatprep.subr.mxu0 %v695_v0 }
  0x48   :  { %595 = vmatpush3.msra.mxu0 %v225_v45 }
  0x49   :  { %596 = vmatprep.subr.mxu0 %v695_v0 }
  0x4a   :  { %597 = vmatpush3.msra.mxu0 %v224_v46 }
  0x4b   :  { %598 = vmatprep.subr.mxu0 %v695_v0 }
  0x4c   :  { %599 = vmatpush3.msra.mxu0 %v223_v52 }
  0x4d   :  { %600 = vmatprep.subr.mxu0 %v695_v0 }
  0x4e   :  { %601 = vmatpush3.msra.mxu0 %v222_v53 }
  0x4f   :  { %602 = vmatprep.subr.mxu0 %v695_v0 }
  0x50   :  { %603 = vmatpush3.msra.mxu0 %v221_v54 }
  0xf0   :  { %v119_v48 = vpop.f32.mrf.mxu0 }
  0xf1   :  { %v120_v49 = vadd.f32 %v427_v47, %v119_v48 }
  0xf2   :  { %v536_v50 = vpop.f32.mrf.mxu0 }
  0xf3   :  { %v123_v51 = vmax.f32 %v120_v49, 0.0 }
  0xf5   :  { %570 = vmatmul.mubr.f32.vlgmr.msra.gmra.mxu1 %v123_v51 }
  0xf6   :  { %639 = vmatprep.mubr.msk.f32.mxu1 %vm696_vm0, %v695_v0  ;;  %608 = vmatpush3.msra.mxu1 %v332_v55 }
  0xf7   :  { %609 = vmatprep.subr.mxu1 %v695_v0 }
  0xf8   :  { %610 = vmatpush3.msra.mxu1 %v331_v56 }
  0xf9   :  { %611 = vmatprep.subr.mxu1 %v695_v0 }
  0xfa   :  { %612 = vmatpush3.msra.mxu1 %v330_v57 }
  0xfb   :  { %613 = vmatprep.subr.mxu1 %v695_v0 }
  0xfc   :  { %614 = vmatpush3.msra.mxu1 %v329_v58 }
  0xfd   :  { %615 = vmatprep.subr.mxu1 %v695_v0 }
  0xfe   :  { %616 = vmatpush3.msra.mxu1 %v328_v59 }
  0xff   :  { %617 = vmatprep.subr.mxu1 %v695_v0 }
 0x100   :  { %618 = vmatpush3.msra.mxu1 %v327_v60 }
 0x101   :  { %619 = vmatprep.subr.mxu1 %v695_v0 }
 0x102   :  { %620 = vmatpush3.msra.mxu1 %v326_v61 }
 0x103   :  { %621 = vmatprep.subr.mxu1 %v695_v0 }
 0x104   :  { %622 = vmatpush3.msra.mxu1 %v325_v62 }
 0x105   :  { %623 = vmatprep.subr.mxu1 %v695_v0 }
 0x106   :  { %624 = vmatpush3.msra.mxu1 %v324_v63 }
 0x107   :  { %625 = vmatprep.subr.mxu1 %v695_v0 }
 0x108   :  { %626 = vmatpush3.msra.mxu1 %v323_v1 }
 0x109   :  { %627 = vmatprep.subr.mxu1 %v695_v0 }
 0x10a   :  { %628 = vmatpush3.msra.mxu1 %v322_v2 }
 0x10b   :  { %629 = vmatprep.subr.mxu1 %v695_v0 }
 0x10c   :  { %630 = vmatpush3.msra.mxu1 %v321_v3 }
 0x10d   :  { %631 = vmatprep.subr.mxu1 %v695_v0 }
 0x10e   :  { %632 = vmatpush3.msra.mxu1 %v320_v4 }
 0x10f   :  { %633 = vmatprep.subr.mxu1 %v695_v0 }
 0x110   :  { %634 = vmatpush3.msra.mxu1 %v319_v10 }
 0x111   :  { %635 = vmatprep.subr.mxu1 %v695_v0 }
 0x112   :  { %636 = vmatpush3.msra.mxu1 %v318_v11 }
 0x113   :  { %637 = vmatprep.subr.mxu1 %v695_v0 }
 0x114   :  { %638 = vmatpush3.msra.mxu1 %v317_v12 }
 0x1b5   :  { %v215_v6 = vpop.f32.mrf.mxu1 }
 0x1b6   :  { %v216_v7 = vadd.f32 %v429_v5, %v215_v6 }
 0x1b7   :  { %v571_v8 = vpop.f32.mrf.mxu1 }
 0x1b8   :  { %v219_v9 = vmax.f32 %v216_v7, 0.0 }
 0x1ba   :  { %605 = vmatmul.mubr.f32.vlgmr.msra.gmra.mxu0 %v219_v9 }
 0x27a   :  { %v311_v14 = vpop.f32.mrf.mxu0 }
 0x27b   :  { %v312_v15 = vadd.f32 %v431_v13, %v311_v14 }
 0x27c   :  { %v606_v16 = vpop.f32.mrf.mxu0 }
 0x27d   :  { %v315_v17 = vmax.f32 %v312_v15, 0.0 }
 0x27f   :  { %640 = vmatmul.mubr.f32.vlgmr.msra.gmra.mxu1 %v315_v17 }
 0x33f   :  { %v407_v19 = vpop.f32.mrf.mxu1 }
 0x340   :  { %v408_v20 = vadd.f32 %v433_v18, %v407_v19 }
 0x341   :  { %v641_v0 = vpop.f32.mrf.mxu1 }
 0x342   :  { %411 = vst [vmem:[#allocation5] sm:$0xff] %v408_v20 }
 0x343   :  { %679 = shalt.err (!%p676_p9)
}
 0x344   :  { %421 = dma.vmem_to_hbm [thread:$0]  %s419_s28, 128, %s814_s3, [#allocation4]  }
 0x345   :  { %690 = dma.done.wait [#allocation4], 128  }
 0x346   :  { %691 = vsyncadd [#allocation4], 4294967168 }
 0x347   :  { %425 = vsyncpa [#allocation3], 1 }
 0x348   :  { %426 = vsyncpa [#allocation4], 1 }

</bundles_post_ra>
